<compile_context>
chip_gen: v6e
topology: v6e:2x2x1
jax: 0.10.0
libtpu: 0.0.40
codegen_flags: <defaults>
</compile_context>

<pallas_src>
import functools

import jax
import jax.numpy as jnp
from jax.experimental import pallas as pl
from jax.experimental.pallas import tpu as pltpu


def _round_up(v, m):
    return (v + m - 1) // m * m


def _kwinners_body(x, boosted, out_ref, k):
    """Threshold-chasing top-k: after k-1 refinements t holds the k-th
    largest boosted value per row; winners are boosted >= t."""
    neg_inf = jnp.float32(-jnp.inf)
    # k is small (n * sparsity = 10 here); a fully unrolled static loop over
    # k-1 single cross-lane XLU reductions is fine.
    # TODO(synk): if bundle dumps show the 2 XLUs binding on v6e/v7x, pre-fold
    # the four 128-lane column blocks with VPU jnp.maximum (static slices,
    # no reshape) before one 128-lane cross-lane reduce.
    t = jnp.max(boosted, axis=-1, keepdims=True)                # 1st largest
    for _ in range(k - 1):
        masked = jnp.where(boosted < t, boosted, neg_inf)       # strictly-below set
        t = jnp.max(masked, axis=-1, keepdims=True)             # next largest
    out_ref[...] = jnp.where(boosted >= t, x, jnp.float32(0.0)).astype(out_ref.dtype)


def _kwinners_boost_kernel(x_ref, boost_ref, out_ref, *, k):
    x = x_ref[...].astype(jnp.float32)                          # (TB, N)
    _kwinners_body(x, x * boost_ref[...], out_ref, k)           # (1, N) broadcasts


def _kwinners_plain_kernel(x_ref, out_ref, *, k):
    x = x_ref[...].astype(jnp.float32)
    _kwinners_body(x, x, out_ref, k)


def spatial_pooler_forward(x, duty_cycle, *, k, boost_strength,
                           max_batch_tile=512):
    """KWinners forward: x [B, N], duty_cycle [N] -> sparse SDR [B, N].

    max_batch_tile=512 keeps double-buffered in+out f32 tiles at ~4 MiB,
    well inside the scoped-VMEM default on v5e (16 MiB) and v6e/v7x (32 MiB);
    the kernel is compute-bound so larger tiles buy nothing.
    """
    B, N = x.shape
    assert N % 128 == 0, "feature dim must be lane-aligned (multiple of 128)"
    assert k >= 1

    # Batch tile: multiple of 8 (f32 sublanes); aim for >= 4 grid steps so
    # v7x's two TensorCores both get work and DMA overlaps compute.
    TB = min(max_batch_tile, max(8, _round_up(pl.cdiv(B, 4), 8)))
    B_pad = _round_up(B, TB)
    if B_pad != B:
        # Padded rows are all-zero; they produce all-zero output rows and are
        # sliced off below.
        x_in = jnp.zeros((B_pad, N), x.dtype).at[:B].set(x)
    else:
        x_in = x

    grid = (B_pad // TB,)
    x_spec = pl.BlockSpec((TB, N), lambda i: (i, 0))
    out_spec = pl.BlockSpec((TB, N), lambda i: (i, 0))
    cparams = pltpu.CompilerParams(dimension_semantics=("parallel",))
    out_shape = jax.ShapeDtypeStruct((B_pad, N), x.dtype)

    if boost_strength > 0.0:
        # Hoisted boost row: the EUP exp runs once in the wrapper, not per tile.
        target_density = float(k) / float(N)
        boost = jnp.exp(
            (target_density - duty_cycle.astype(jnp.float32))
            * jnp.float32(boost_strength)).reshape(1, N)
        out = pl.pallas_call(
            functools.partial(_kwinners_boost_kernel, k=k),
            out_shape=out_shape,
            grid=grid,
            in_specs=[x_spec, pl.BlockSpec((1, N), lambda i: (0, 0))],
            out_specs=out_spec,
            compiler_params=cparams,
        )(x_in, boost)
    else:
        # Specialization: no boost operand at all (no dead DMA / double-buffer).
        out = pl.pallas_call(
            functools.partial(_kwinners_plain_kernel, k=k),
            out_shape=out_shape,
            grid=grid,
            in_specs=[x_spec],
            out_specs=out_spec,
            compiler_params=cparams,
        )(x_in)

    return out[:B] if B_pad != B else out


def update_duty_cycle(sdr, duty_cycle, learning_iterations, duty_cycle_period):
    """Functional equivalent of SpatialPooler.update_duty_cycle (cheap
    stateful buffer update done in plain JAX; not the hot path)."""
    batch_size = sdr.shape[0]
    learning_iterations = learning_iterations + batch_size
    period = jnp.minimum(jnp.float32(duty_cycle_period),
                         learning_iterations.astype(jnp.float32))
    new_duty = (duty_cycle * (period - batch_size)
                + (sdr > 0).sum(axis=0).astype(jnp.float32)) / period
    return new_duty, learning_iterations


def _kwinners_ref(x, duty_cycle, k, boost_strength):
    """Pure-JAX reference for validation (torch F.kwinners semantics)."""
    n = x.shape[1]
    if boost_strength > 0.0:
        boosted = x * jnp.exp((k / n - duty_cycle[None, :]) * boost_strength)
    else:
        boosted = x
    thresh = jax.lax.top_k(boosted, k)[0][:, -1:]
    return jnp.where(boosted >= thresh, x, 0.0)


if __name__ == "__main__":
    # Module config (matches SpatialPooler.__init__ defaults).
    input_dims = 512
    sparsity = 0.02
    boost_strength = 1.0
    duty_cycle_period = 1000
    k = int(round(input_dims * sparsity))          # k = 10

    batch = 4
    key = jax.random.PRNGKey(0)
    kx, kd, kx2 = jax.random.split(key, 3)
    x = jax.random.normal(kx, (batch, input_dims), dtype=jnp.float32)
    # duty_cycle buffer: zeros in the module; use a small deterministic
    # non-zero init so the boosting term is actually exercised.
    duty_cycle = jax.random.uniform(kd, (input_dims,), dtype=jnp.float32,
                                    minval=0.0, maxval=0.05)
    learning_iterations = jnp.int32(0)

    sdr = spatial_pooler_forward(x, duty_cycle, k=k,
                                 boost_strength=boost_strength)
    sdr = jax.block_until_ready(sdr)

    # Validate against pure-JAX reference (identical for tie-free inputs).
    ref = _kwinners_ref(x, duty_cycle, k, boost_strength)
    assert sdr.shape == (batch, input_dims)
    assert jnp.allclose(sdr, ref, atol=1e-6), "Pallas kwinners mismatch vs reference"
    # Exactly k winners per row (random normal activations: no ties, no exact zeros).
    assert bool(jnp.all((sdr != 0).sum(axis=1) == k))

    # boost_strength == 0 path (separate specialization, no boost operand).
    sdr_nb = jax.block_until_ready(
        spatial_pooler_forward(x, duty_cycle, k=k, boost_strength=0.0))
    ref_nb = _kwinners_ref(x, duty_cycle, k, 0.0)
    assert jnp.allclose(sdr_nb, ref_nb, atol=1e-6)

    # Multi-tile grid path (batch padded, several grid steps on one TC / two on v7x).
    batch_big = 50
    x_big = jax.random.normal(kx2, (batch_big, input_dims), dtype=jnp.float32)
    sdr_big = jax.block_until_ready(
        spatial_pooler_forward(x_big, duty_cycle, k=k,
                               boost_strength=boost_strength))
    ref_big = _kwinners_ref(x_big, duty_cycle, k, boost_strength)
    assert sdr_big.shape == (batch_big, input_dims)
    assert jnp.allclose(sdr_big, ref_big, atol=1e-6)

    # Training-mode buffer update (functional, outside the kernel).
    duty_cycle, learning_iterations = update_duty_cycle(
        sdr, duty_cycle, learning_iterations, duty_cycle_period)
    jax.block_until_ready(duty_cycle)

    print("KERNEL_OK")
</pallas_src>

<mosaic_0001>
module attributes {stable_mosaic.version = 11 : i64} {
  func.func @_kwinners_boost_kernel(%arg0: i32, %arg1: memref<8x512xf32, #tpu.memory_space<vmem>>, %arg2: memref<1x512xf32, #tpu.memory_space<vmem>>, %arg3: memref<8x512xf32, #tpu.memory_space<vmem>>) attributes {dimension_semantics = [#tpu.dimension_semantics<parallel>], iteration_bounds = array<i64: 1>, scalar_prefetch = 0 : i64, scratch_operands = 0 : i64, tpu.core_type = #tpu.core_type<tc>, window_params = [{transform_indices = @transform_0, window_bounds = array<i64: 8, 512>}, {pipeline_mode = #tpu.pipeline_mode<synchronous>, transform_indices = @transform_1, window_bounds = array<i64: 1, 512>}, {transform_indices = @transform_2, window_bounds = array<i64: 8, 512>}]} {
    %c0 = arith.constant 0 : index
    %c0_0 = arith.constant 0 : index
    %0 = vector.load %arg1[%c0, %c0_0] : memref<8x512xf32, #tpu.memory_space<vmem>>, vector<8x512xf32>
    %c0_1 = arith.constant 0 : index
    %c0_2 = arith.constant 0 : index
    %1 = vector.load %arg2[%c0_1, %c0_2] : memref<1x512xf32, #tpu.memory_space<vmem>>, vector<1x512xf32>
    %2 = vector.broadcast %1 : vector<1x512xf32> to vector<8x512xf32>
    %3 = arith.mulf %0, %2 : vector<8x512xf32>
    %cst = arith.constant dense<0xFF800000> : vector<8xf32>
    %4 = vector.multi_reduction <maximumf>, %3, %cst [1] : vector<8x512xf32> to vector<8xf32>
    %5 = vector.shape_cast %4 : vector<8xf32> to vector<8x1xf32>
    %6 = vector.broadcast %5 : vector<8x1xf32> to vector<8x512xf32>
    %7 = arith.cmpf olt, %3, %6 : vector<8x512xf32>
    %cst_3 = arith.constant 0xFF800000 : f32
    %8 = vector.broadcast %cst_3 : f32 to vector<8x512xf32>
    %9 = arith.select %7, %3, %8 : vector<8x512xi1>, vector<8x512xf32>
    %cst_4 = arith.constant dense<0xFF800000> : vector<8xf32>
    %10 = vector.multi_reduction <maximumf>, %9, %cst_4 [1] : vector<8x512xf32> to vector<8xf32>
    %11 = vector.shape_cast %10 : vector<8xf32> to vector<8x1xf32>
    %12 = vector.broadcast %11 : vector<8x1xf32> to vector<8x512xf32>
    %13 = arith.cmpf olt, %3, %12 : vector<8x512xf32>
    %cst_5 = arith.constant 0xFF800000 : f32
    %14 = vector.broadcast %cst_5 : f32 to vector<8x512xf32>
    %15 = arith.select %13, %3, %14 : vector<8x512xi1>, vector<8x512xf32>
    %cst_6 = arith.constant dense<0xFF800000> : vector<8xf32>
    %16 = vector.multi_reduction <maximumf>, %15, %cst_6 [1] : vector<8x512xf32> to vector<8xf32>
    %17 = vector.shape_cast %16 : vector<8xf32> to vector<8x1xf32>
    %18 = vector.broadcast %17 : vector<8x1xf32> to vector<8x512xf32>
    %19 = arith.cmpf olt, %3, %18 : vector<8x512xf32>
    %cst_7 = arith.constant 0xFF800000 : f32
    %20 = vector.broadcast %cst_7 : f32 to vector<8x512xf32>
    %21 = arith.select %19, %3, %20 : vector<8x512xi1>, vector<8x512xf32>
    %cst_8 = arith.constant dense<0xFF800000> : vector<8xf32>
    %22 = vector.multi_reduction <maximumf>, %21, %cst_8 [1] : vector<8x512xf32> to vector<8xf32>
    %23 = vector.shape_cast %22 : vector<8xf32> to vector<8x1xf32>
    %24 = vector.broadcast %23 : vector<8x1xf32> to vector<8x512xf32>
    %25 = arith.cmpf olt, %3, %24 : vector<8x512xf32>
    %cst_9 = arith.constant 0xFF800000 : f32
    %26 = vector.broadcast %cst_9 : f32 to vector<8x512xf32>
    %27 = arith.select %25, %3, %26 : vector<8x512xi1>, vector<8x512xf32>
    %cst_10 = arith.constant dense<0xFF800000> : vector<8xf32>
    %28 = vector.multi_reduction <maximumf>, %27, %cst_10 [1] : vector<8x512xf32> to vector<8xf32>
    %29 = vector.shape_cast %28 : vector<8xf32> to vector<8x1xf32>
    %30 = vector.broadcast %29 : vector<8x1xf32> to vector<8x512xf32>
    %31 = arith.cmpf olt, %3, %30 : vector<8x512xf32>
    %cst_11 = arith.constant 0xFF800000 : f32
    %32 = vector.broadcast %cst_11 : f32 to vector<8x512xf32>
    %33 = arith.select %31, %3, %32 : vector<8x512xi1>, vector<8x512xf32>
    %cst_12 = arith.constant dense<0xFF800000> : vector<8xf32>
    %34 = vector.multi_reduction <maximumf>, %33, %cst_12 [1] : vector<8x512xf32> to vector<8xf32>
    %35 = vector.shape_cast %34 : vector<8xf32> to vector<8x1xf32>
    %36 = vector.broadcast %35 : vector<8x1xf32> to vector<8x512xf32>
    %37 = arith.cmpf olt, %3, %36 : vector<8x512xf32>
    %cst_13 = arith.constant 0xFF800000 : f32
    %38 = vector.broadcast %cst_13 : f32 to vector<8x512xf32>
    %39 = arith.select %37, %3, %38 : vector<8x512xi1>, vector<8x512xf32>
    %cst_14 = arith.constant dense<0xFF800000> : vector<8xf32>
    %40 = vector.multi_reduction <maximumf>, %39, %cst_14 [1] : vector<8x512xf32> to vector<8xf32>
    %41 = vector.shape_cast %40 : vector<8xf32> to vector<8x1xf32>
    %42 = vector.broadcast %41 : vector<8x1xf32> to vector<8x512xf32>
    %43 = arith.cmpf olt, %3, %42 : vector<8x512xf32>
    %cst_15 = arith.constant 0xFF800000 : f32
    %44 = vector.broadcast %cst_15 : f32 to vector<8x512xf32>
    %45 = arith.select %43, %3, %44 : vector<8x512xi1>, vector<8x512xf32>
    %cst_16 = arith.constant dense<0xFF800000> : vector<8xf32>
    %46 = vector.multi_reduction <maximumf>, %45, %cst_16 [1] : vector<8x512xf32> to vector<8xf32>
    %47 = vector.shape_cast %46 : vector<8xf32> to vector<8x1xf32>
    %48 = vector.broadcast %47 : vector<8x1xf32> to vector<8x512xf32>
    %49 = arith.cmpf olt, %3, %48 : vector<8x512xf32>
    %cst_17 = arith.constant 0xFF800000 : f32
    %50 = vector.broadcast %cst_17 : f32 to vector<8x512xf32>
    %51 = arith.select %49, %3, %50 : vector<8x512xi1>, vector<8x512xf32>
    %cst_18 = arith.constant dense<0xFF800000> : vector<8xf32>
    %52 = vector.multi_reduction <maximumf>, %51, %cst_18 [1] : vector<8x512xf32> to vector<8xf32>
    %53 = vector.shape_cast %52 : vector<8xf32> to vector<8x1xf32>
    %54 = vector.broadcast %53 : vector<8x1xf32> to vector<8x512xf32>
    %55 = arith.cmpf olt, %3, %54 : vector<8x512xf32>
    %cst_19 = arith.constant 0xFF800000 : f32
    %56 = vector.broadcast %cst_19 : f32 to vector<8x512xf32>
    %57 = arith.select %55, %3, %56 : vector<8x512xi1>, vector<8x512xf32>
    %cst_20 = arith.constant dense<0xFF800000> : vector<8xf32>
    %58 = vector.multi_reduction <maximumf>, %57, %cst_20 [1] : vector<8x512xf32> to vector<8xf32>
    %59 = vector.shape_cast %58 : vector<8xf32> to vector<8x1xf32>
    %60 = vector.broadcast %59 : vector<8x1xf32> to vector<8x512xf32>
    %61 = arith.cmpf oge, %3, %60 : vector<8x512xf32>
    %cst_21 = arith.constant 0.000000e+00 : f32
    %62 = vector.broadcast %cst_21 : f32 to vector<8x512xf32>
    %63 = arith.select %61, %0, %62 : vector<8x512xi1>, vector<8x512xf32>
    %c0_22 = arith.constant 0 : index
    %c0_23 = arith.constant 0 : index
    %64 = vector.load %arg3[%c0_22, %c0_23] : memref<8x512xf32, #tpu.memory_space<vmem>>, vector<8x512xf32>
    tpu.vector_store %arg3[%c0_22, %c0_23], %63 {strides = array<i32>} : memref<8x512xf32, #tpu.memory_space<vmem>>, vector<8x512xf32>,
    return
  }
  func.func @transform_0(%arg0: i32) -> (i32, i32) {
    %c0_i32 = arith.constant 0 : i32
    %c0_i32_0 = arith.constant 0 : i32
    return %arg0, %c0_i32 : i32, i32
  }
  func.func @transform_1(%arg0: i32) -> (i32, i32) {
    %c0_i32 = arith.constant 0 : i32
    %c0_i32_0 = arith.constant 0 : i32
    %c0_i32_1 = arith.constant 0 : i32
    return %c0_i32, %c0_i32_0 : i32, i32
  }
  func.func @transform_2(%arg0: i32) -> (i32, i32) {
    %c0_i32 = arith.constant 0 : i32
    %c0_i32_0 = arith.constant 0 : i32
    return %arg0, %c0_i32 : i32, i32
  }
}

</mosaic_0001>

<bundles_post_ra>
// kernel: tpu_custom_call.1
= control target key start
LH: loop header
LB: loop body
LE: loop exit
PB: predicated region body
PF: predicated region fallthrough
CT: control target
= control target key end

     0   :  { %7 = vsyncpa [#allocation3], 0  ;;  %s416_s0 = inlined_call_operand.hbm [shape: f32[8,512], index: 0, kind: input, shape index: {}]   ;;  %s417_s1 = inlined_call_operand.hbm [shape: f32[1,512], index: 1, kind: input, shape index: {}]   ;;  %s418_s2 = inlined_call_operand.hbm [shape: f32[8,512], index: 2, kind: output, shape index: {}]  }
   0x1   :  { %8 = vsyncpa [#allocation6], 0 }
   0x2   :  { %9 = vsyncpa [#allocation4], 0  ;;  %s285_s9 = smov [#allocation2]   ;;  %s286_s11 = smov [#allocation5]  }
   0x3   :  { %s16_s10 = sshll.u32 %s285_s9, 4  ;;  %s26_s12 = sshll.u32 %s286_s11, 4  ;;  %s17_s10 = int_to_ptr.vmem [resolvable:$true] %s16_s10  ;;  %s27_s12 = int_to_ptr.vmem [resolvable:$true] %s26_s12 }
   0x4   :  { %s227_s13 = scalar_lea.vmem %s17_s10, 512  ;;  %p232_p1 = scmp.lt.s32.totalorder %s17_s10, %s17_s10 }
   0x5   :  { %p228_p0 = scmp.ne.s32.totalorder %s17_s10, %s227_s13  ;;  %p233_p2 = scmp.lt.s32.totalorder %s227_s13, %s227_s13 }
   0x7   :  { %p234_p3 = por %p233_p2, %p232_p1 }
   0x9   :  { %p235_p4 = pnand %p234_p3, %p228_p0 }
   0xb   :  { %238 = shalt.err (!%p235_p4)
}
   0xc   :  { %19 = dma.hbm_to_vmem [thread:$0]  %s416_s0, 512, %s17_s10, [#allocation3]  }
   0xd   :  { %s247_s16 = scalar_lea.vmem %s27_s12, 64  ;;  %p252_p6 = scmp.lt.s32.totalorder %s27_s12, %s27_s12 }
   0xe   :  { %p248_p5 = scmp.ne.s32.totalorder %s27_s12, %s247_s16  ;;  %p253_p7 = scmp.lt.s32.totalorder %s247_s16, %s247_s16 }
  0x10   :  { %p254_p8 = por %p253_p7, %p252_p6 }
  0x12   :  { %p255_p9 = pnand %p254_p8, %p248_p5 }
  0x14   :  { %258 = shalt.err (!%p255_p9)
}
  0x15   :  { %29 = dma.hbm_to_vmem [thread:$0]  %s417_s1, 64, %s27_s12, [#allocation6]  }
  0x16   :  { %279 = dma.done.wait [#allocation3], 512  }
  0x17   :  { %280 = vsyncadd [#allocation3], 4294966784 }
  0x18   :  { %281 = dma.done.wait [#allocation6], 64  }
  0x19   :  { %282 = vsyncadd [#allocation6], 4294967232  ;;  %v42_v0 = vlaneseq  ;;  %v309_v6 = vld [vmem:[#allocation2] sm:$0xff]  ;;  %v311_v7 = vld [vmem:[#allocation2 + $0x8] sm:$0xff]  ;;  %s287_s0 = smov [#allocation7]  }
  0x1a   :  { %v313_v8 = vld [vmem:[#allocation2 + $0x10] sm:$0xff]  ;;  %v315_v9 = vld [vmem:[#allocation2 + $0x18] sm:$0xff]  ;;  %v40_v10 = vld [vmem:[#allocation5] sm:$0xf]  ;;  %s206_s1 = sshll.u32 %s287_s0, 4  ;;  %s207_s1 = int_to_ptr.vmem [resolvable:$true] %s206_s1 }
  0x1b   :  { %v43_v1 = vshrl.u32 %v42_v0, 7  ;;  %s259_s19 = scalar_lea.vmem %s207_s1, 512  ;;  %p264_p11 = scmp.lt.s32.totalorder %s207_s1, %s207_s1 }
  0x1c   :  { %p260_p10 = scmp.ne.s32.totalorder %s207_s1, %s259_s19  ;;  %p265_p12 = scmp.lt.s32.totalorder %s259_s19, %s259_s19 }
  0x1d   :  { %v44_v2 = vsub.s32 0, %v43_v1  ;;  %v48_v3 = vsub.s32 1, %v43_v1  ;;  %v52_v4 = vsub.s32 2, %v43_v1  ;;  %v56_v5 = vsub.s32 3, %v43_v1 }
  0x1e   :  { %p266_p13 = por %p265_p12, %p264_p11 }
  0x1f   :  { %v45_v11 = vrot.slane %v40_v10, %v44_v2  ;;  %v49_v12 = vrot.slane %v40_v10, %v48_v3  ;;  %v53_v13 = vrot.slane %v40_v10, %v52_v4  ;;  %v57_v14 = vrot.slane %v40_v10, %v56_v5 }
  0x20   :  { %p267_p0 = pnand %p266_p13, %p260_p10 }
  0x21   :  { %v318_v15 = vmul.f32 %v45_v11, %v309_v6  ;;  %v321_v16 = vmul.f32 %v49_v12, %v311_v7  ;;  %v324_v17 = vmul.f32 %v53_v13, %v313_v8  ;;  %v327_v18 = vmul.f32 %v57_v14, %v315_v9 }
  0x23   :  { %v66_v19 = vmax.f32 %v318_v15, %v321_v16  ;;  %v67_v20 = vmax.f32 %v324_v17, %v327_v18 }
  0x25   :  { %v68_v21 = vmax.f32 %v66_v19, %v67_v20 }
  0x27   :  { %69 = vmax.xlane.f32.xlu0 %v68_v21 }
  0xb0   :  { %v70_v22 = vpop.xlane.xlu0 %69 }
  0xb1   :  { %vm71_vm0 = vcmp.lt.f32.partialorder %v318_v15, %v70_v22  ;;  %vm72_vm1 = vcmp.lt.f32.partialorder %v321_v16, %v70_v22  ;;  %vm73_vm2 = vcmp.lt.f32.partialorder %v324_v17, %v70_v22  ;;  %vm74_vm3 = vcmp.lt.f32.partialorder %v327_v18, %v70_v22 }
  0xb2   :  { %v75_v23 = vsel %vm71_vm0, %v318_v15, -inf  ;;  %v76_v24 = vsel %vm72_vm1, %v321_v16, -inf  ;;  %v77_v25 = vsel %vm73_vm2, %v324_v17, -inf  ;;  %v78_v26 = vsel %vm74_vm3, %v327_v18, -inf }
  0xb3   :  { %v79_v27 = vmax.f32 %v75_v23, %v76_v24  ;;  %v80_v28 = vmax.f32 %v77_v25, %v78_v26 }
  0xb5   :  { %v81_v29 = vmax.f32 %v79_v27, %v80_v28 }
  0xb7   :  { %82 = vmax.xlane.f32.xlu0 %v81_v29 }
 0x140   :  { %v83_v30 = vpop.xlane.xlu0 %82 }
 0x141   :  { %vm84_vm4 = vcmp.lt.f32.partialorder %v318_v15, %v83_v30  ;;  %vm85_vm5 = vcmp.lt.f32.partialorder %v321_v16, %v83_v30  ;;  %vm86_vm6 = vcmp.lt.f32.partialorder %v324_v17, %v83_v30  ;;  %vm87_vm7 = vcmp.lt.f32.partialorder %v327_v18, %v83_v30 }
 0x142   :  { %v88_v31 = vsel %vm84_vm4, %v318_v15, -inf  ;;  %v89_v32 = vsel %vm85_vm5, %v321_v16, -inf  ;;  %v90_v33 = vsel %vm86_vm6, %v324_v17, -inf  ;;  %v91_v34 = vsel %vm87_vm7, %v327_v18, -inf }
 0x143   :  { %v92_v35 = vmax.f32 %v88_v31, %v89_v32  ;;  %v93_v36 = vmax.f32 %v90_v33, %v91_v34 }
 0x145   :  { %v94_v37 = vmax.f32 %v92_v35, %v93_v36 }
 0x147   :  { %95 = vmax.xlane.f32.xlu1 %v94_v37 }
 0x1d0   :  { %v96_v38 = vpop.xlane.xlu1 %95 }
 0x1d1   :  { %vm97_vm8 = vcmp.lt.f32.partialorder %v318_v15, %v96_v38  ;;  %vm98_vm9 = vcmp.lt.f32.partialorder %v321_v16, %v96_v38  ;;  %vm99_vm10 = vcmp.lt.f32.partialorder %v324_v17, %v96_v38  ;;  %vm100_vm11 = vcmp.lt.f32.partialorder %v327_v18, %v96_v38 }
 0x1d2   :  { %v101_v39 = vsel %vm97_vm8, %v318_v15, -inf  ;;  %v102_v40 = vsel %vm98_vm9, %v321_v16, -inf  ;;  %v103_v41 = vsel %vm99_vm10, %v324_v17, -inf  ;;  %v104_v42 = vsel %vm100_vm11, %v327_v18, -inf }
 0x1d3   :  { %v105_v43 = vmax.f32 %v101_v39, %v102_v40  ;;  %v106_v44 = vmax.f32 %v103_v41, %v104_v42 }
 0x1d5   :  { %v107_v45 = vmax.f32 %v105_v43, %v106_v44 }
 0x1d7   :  { %108 = vmax.xlane.f32.xlu1 %v107_v45 }
 0x260   :  { %v109_v46 = vpop.xlane.xlu1 %108 }
 0x261   :  { %vm110_vm12 = vcmp.lt.f32.partialorder %v318_v15, %v109_v46  ;;  %vm111_vm13 = vcmp.lt.f32.partialorder %v321_v16, %v109_v46  ;;  %vm112_vm14 = vcmp.lt.f32.partialorder %v324_v17, %v109_v46  ;;  %vm113_vm15 = vcmp.lt.f32.partialorder %v327_v18, %v109_v46 }
 0x262   :  { %v114_v47 = vsel %vm110_vm12, %v318_v15, -inf  ;;  %v115_v48 = vsel %vm111_vm13, %v321_v16, -inf  ;;  %v116_v49 = vsel %vm112_vm14, %v324_v17, -inf  ;;  %v117_v50 = vsel %vm113_vm15, %v327_v18, -inf }
 0x263   :  { %v118_v51 = vmax.f32 %v114_v47, %v115_v48  ;;  %v119_v52 = vmax.f32 %v116_v49, %v117_v50 }
 0x265   :  { %v120_v53 = vmax.f32 %v118_v51, %v119_v52 }
 0x267   :  { %121 = vmax.xlane.f32.xlu0 %v120_v53 }
 0x2f0   :  { %v122_v54 = vpop.xlane.xlu0 %121 }
 0x2f1   :  { %vm123_vm0 = vcmp.lt.f32.partialorder %v318_v15, %v122_v54  ;;  %vm124_vm1 = vcmp.lt.f32.partialorder %v321_v16, %v122_v54  ;;  %vm125_vm2 = vcmp.lt.f32.partialorder %v324_v17, %v122_v54  ;;  %vm126_vm3 = vcmp.lt.f32.partialorder %v327_v18, %v122_v54 }
 0x2f2   :  { %v127_v55 = vsel %vm123_vm0, %v318_v15, -inf  ;;  %v128_v56 = vsel %vm124_vm1, %v321_v16, -inf  ;;  %v129_v57 = vsel %vm125_vm2, %v324_v17, -inf  ;;  %v130_v58 = vsel %vm126_vm3, %v327_v18, -inf }
 0x2f3   :  { %v131_v59 = vmax.f32 %v127_v55, %v128_v56  ;;  %v132_v60 = vmax.f32 %v129_v57, %v130_v58 }
 0x2f5   :  { %v133_v61 = vmax.f32 %v131_v59, %v132_v60 }
 0x2f7   :  { %134 = vmax.xlane.f32.xlu1 %v133_v61 }
 0x380   :  { %v135_v62 = vpop.xlane.xlu1 %134 }
 0x381   :  { %vm136_vm4 = vcmp.lt.f32.partialorder %v318_v15, %v135_v62  ;;  %vm137_vm5 = vcmp.lt.f32.partialorder %v321_v16, %v135_v62  ;;  %vm138_vm6 = vcmp.lt.f32.partialorder %v324_v17, %v135_v62  ;;  %vm139_vm7 = vcmp.lt.f32.partialorder %v327_v18, %v135_v62 }
 0x382   :  { %v140_v63 = vsel %vm136_vm4, %v318_v15, -inf  ;;  %v141_v0 = vsel %vm137_vm5, %v321_v16, -inf  ;;  %v142_v1 = vsel %vm138_vm6, %v324_v17, -inf  ;;  %v143_v2 = vsel %vm139_vm7, %v327_v18, -inf }
 0x383   :  { %v144_v3 = vmax.f32 %v140_v63, %v141_v0  ;;  %v145_v4 = vmax.f32 %v142_v1, %v143_v2 }
 0x385   :  { %v146_v5 = vmax.f32 %v144_v3, %v145_v4 }
 0x387   :  { %147 = vmax.xlane.f32.xlu0 %v146_v5 }
 0x410   :  { %v148_v10 = vpop.xlane.xlu0 %147 }
 0x411   :  { %vm149_vm8 = vcmp.lt.f32.partialorder %v318_v15, %v148_v10  ;;  %vm150_vm9 = vcmp.lt.f32.partialorder %v321_v16, %v148_v10  ;;  %vm151_vm10 = vcmp.lt.f32.partialorder %v324_v17, %v148_v10  ;;  %vm152_vm11 = vcmp.lt.f32.partialorder %v327_v18, %v148_v10 }
 0x412   :  { %v153_v11 = vsel %vm149_vm8, %v318_v15, -inf  ;;  %v154_v12 = vsel %vm150_vm9, %v321_v16, -inf  ;;  %v155_v13 = vsel %vm151_vm10, %v324_v17, -inf  ;;  %v156_v14 = vsel %vm152_vm11, %v327_v18, -inf }
 0x413   :  { %v157_v19 = vmax.f32 %v153_v11, %v154_v12  ;;  %v158_v20 = vmax.f32 %v155_v13, %v156_v14 }
 0x415   :  { %v159_v21 = vmax.f32 %v157_v19, %v158_v20 }
 0x417   :  { %160 = vmax.xlane.f32.xlu1 %v159_v21 }
 0x4a0   :  { %v161_v22 = vpop.xlane.xlu1 %160 }
 0x4a1   :  { %vm162_vm12 = vcmp.lt.f32.partialorder %v318_v15, %v161_v22  ;;  %vm163_vm13 = vcmp.lt.f32.partialorder %v321_v16, %v161_v22  ;;  %vm164_vm14 = vcmp.lt.f32.partialorder %v324_v17, %v161_v22  ;;  %vm165_vm15 = vcmp.lt.f32.partialorder %v327_v18, %v161_v22 }
 0x4a2   :  { %v166_v23 = vsel %vm162_vm12, %v318_v15, -inf  ;;  %v167_v24 = vsel %vm163_vm13, %v321_v16, -inf  ;;  %v168_v25 = vsel %vm164_vm14, %v324_v17, -inf  ;;  %v169_v26 = vsel %vm165_vm15, %v327_v18, -inf }
 0x4a3   :  { %v170_v27 = vmax.f32 %v166_v23, %v167_v24  ;;  %v171_v28 = vmax.f32 %v168_v25, %v169_v26 }
 0x4a5   :  { %v172_v29 = vmax.f32 %v170_v27, %v171_v28 }
 0x4a7   :  { %173 = vmax.xlane.f32.xlu0 %v172_v29 }
 0x530   :  { %v174_v30 = vpop.xlane.xlu0 %173 }
 0x531   :  { %vm175_vm0 = vcmp.lt.f32.partialorder %v318_v15, %v174_v30  ;;  %vm176_vm1 = vcmp.lt.f32.partialorder %v321_v16, %v174_v30  ;;  %vm177_vm2 = vcmp.lt.f32.partialorder %v324_v17, %v174_v30  ;;  %vm178_vm3 = vcmp.lt.f32.partialorder %v327_v18, %v174_v30 }
 0x532   :  { %v179_v31 = vsel %vm175_vm0, %v318_v15, -inf  ;;  %v180_v32 = vsel %vm176_vm1, %v321_v16, -inf  ;;  %v181_v33 = vsel %vm177_vm2, %v324_v17, -inf  ;;  %v182_v34 = vsel %vm178_vm3, %v327_v18, -inf }
 0x533   :  { %v183_v35 = vmax.f32 %v179_v31, %v180_v32  ;;  %v184_v36 = vmax.f32 %v181_v33, %v182_v34 }
 0x535   :  { %v185_v37 = vmax.f32 %v183_v35, %v184_v36 }
 0x537   :  { %186 = vmax.xlane.f32.xlu1 %v185_v37 }
 0x5c0   :  { %v187_v38 = vpop.xlane.xlu1 %186 }
 0x5c1   :  { %vm188_vm4 = vcmp.ge.f32.partialorder %v318_v15, %v187_v38  ;;  %vm189_vm5 = vcmp.ge.f32.partialorder %v321_v16, %v187_v38  ;;  %vm190_vm6 = vcmp.ge.f32.partialorder %v324_v17, %v187_v38  ;;  %vm191_vm7 = vcmp.ge.f32.partialorder %v327_v18, %v187_v38 }
 0x5c2   :  { %v192_v39 = vsel %vm188_vm4, %v309_v6, 0.0  ;;  %v193_v40 = vsel %vm189_vm5, %v311_v7, 0.0  ;;  %v194_v41 = vsel %vm190_vm6, %v313_v8, 0.0  ;;  %v195_v42 = vsel %vm191_vm7, %v315_v9, 0.0 }
 0x5c3   :  { %196 = vst [vmem:[#allocation7] sm:$0xff] %v192_v39  ;;  %197 = vst [vmem:[#allocation7 + $0x8] sm:$0xff] %v193_v40 }
 0x5c4   :  { %198 = vst [vmem:[#allocation7 + $0x10] sm:$0xff] %v194_v41  ;;  %199 = vst [vmem:[#allocation7 + $0x18] sm:$0xff] %v195_v42 }
 0x5c5   :  { %270 = shalt.err (!%p267_p0)
}
 0x5c6   :  { %209 = dma.vmem_to_hbm [thread:$0]  %s207_s1, 512, %s418_s2, [#allocation4]  }
 0x5c7   :  { %283 = dma.done.wait [#allocation4], 512  }
 0x5c8   :  { %284 = vsyncadd [#allocation4], 4294966784 }
 0x5c9   :  { %213 = vsyncpa [#allocation3], 1 }
 0x5ca   :  { %214 = vsyncpa [#allocation6], 1 }
 0x5cb   :  { %215 = vsyncpa [#allocation4], 1 }

</bundles_post_ra>
